<compile_context>
chip_gen: v7x
topology: tpu7x:2x2x1
jax: 0.10.0
libtpu: 0.0.40
codegen_flags: <defaults>
</compile_context>

<pallas_src>
import functools

import jax
import jax.numpy as jnp
from jax.experimental import pallas as pl
from jax.experimental.pallas import tpu as pltpu


def _entropy_loss_kernel(x_ref, o_ref, *, batch_size, tb):
    """One batch tile: sum_i softmax(x_i)*log_softmax(x_i) -> partial sum."""
    i = pl.program_id(0)

    x = x_ref[...].astype(jnp.float32)                       # (tb, C)
    m = jnp.max(x, axis=1, keepdims=True)                    # (tb, 1)
    z = x - m
    e = jnp.exp(z)                                           # single exp pass
    s = jnp.sum(e, axis=1, keepdims=True)                    # (tb, 1)
    ez = jnp.sum(e * z, axis=1, keepdims=True)               # (tb, 1)
    # sum_c p*logp (per row) == sum_c e*z / s - log(s)
    row_ent = ez / s - jnp.log(s)                            # (tb, 1)

    # Mask rows that are zero-padding beyond the real batch.
    row_idx = i * tb + jax.lax.broadcasted_iota(jnp.int32, (tb, 1), 0)
    row_ent = jnp.where(row_idx < batch_size, row_ent, jnp.float32(0.0))

    partial = jnp.sum(row_ent)
    # Lane-dense (8, 128) output tile per grid step; wrapper reads [.., 0, 0].
    o_ref[...] = jnp.full((1, 8, 128), partial, dtype=jnp.float32)


def _round_up(a, b):
    return ((a + b - 1) // b) * b


def entropy_loss(x):
    """x: (B, C) array. Returns scalar f32 = sum(softmax*log_softmax, dim=1) / B."""
    B, C = x.shape
    itemsize = jnp.dtype(x.dtype).itemsize

    # Sublane packing: 8 rows for 32-bit, 16 for 16-bit, 32 for 8-bit dtypes.
    pack = {1: 32, 2: 16, 4: 8}.get(itemsize, 8)

    # Tile sizing: keep the f32 working tile around <= 4 MiB (safe with
    # double buffering on v7x's 64 MiB VMEM and well within v5e/v6e), and
    # cap rows at 1024 (amortization saturates well before that).
    MAX_TILE_ELEMS = 1 << 20          # ~1M elements -> 4 MiB in f32
    ROW_CAP = 1024
    rows_by_vmem = max(pack, MAX_TILE_ELEMS // max(C, 1))
    tb = min(rows_by_vmem, ROW_CAP, _round_up(B, pack))
    tb = max(pack, (tb // pack) * pack)
    # TODO(synk): for vocab-scale C (a (pack, C) tile no longer fits VMEM),
    # add a second grid axis over C with an online max/sum carried in scratch.

    B_pad = _round_up(B, tb)
    if B_pad != B:
        x = jnp.pad(x, ((0, B_pad - B), (0, 0)))
    num_blocks = B_pad // tb

    kernel = functools.partial(_entropy_loss_kernel, batch_size=B, tb=tb)

    partials = pl.pallas_call(
        kernel,
        out_shape=jax.ShapeDtypeStruct((num_blocks, 8, 128), jnp.float32),
        grid_spec=pltpu.PrefetchScalarGridSpec(
            num_scalar_prefetch=0,
            grid=(num_blocks,),
            in_specs=[pl.BlockSpec((tb, C), lambda i: (i, 0))],
            out_specs=pl.BlockSpec((1, 8, 128), lambda i: (i, 0, 0)),
        ),
        compiler_params=pltpu.CompilerParams(
            dimension_semantics=("parallel",),      # independent partial sums
            vmem_limit_bytes=32 * 1024 * 1024,
        ),
        cost_estimate=pl.CostEstimate(
            flops=5 * B_pad * C,
            transcendentals=B_pad * C,
            bytes_accessed=B_pad * C * itemsize + num_blocks * 8 * 128 * 4,
        ),
    )(x)

    return jnp.sum(partials[:, 0, 0]) / jnp.float32(B)


def entropy_loss_ref(x):
    """Pure-JAX reference mirroring the PyTorch module."""
    xf = x.astype(jnp.float32)
    logp = jax.nn.log_softmax(xf, axis=1)
    p = jax.nn.softmax(xf, axis=1)
    return jnp.sum(p * logp) / x.shape[0]


if __name__ == "__main__":
    key = jax.random.PRNGKey(0)

    # Main test: small (B, C) logits, f32.
    B, C = 16, 32
    x = jax.random.normal(key, (B, C), dtype=jnp.float32)
    out = entropy_loss(x)
    jax.block_until_ready(out)
    ref = entropy_loss_ref(x)
    assert jnp.allclose(out, ref, atol=1e-4, rtol=1e-4), (out, ref)

    # Ragged batch (exercises the in-kernel padding mask) + bf16 input.
    B2, C2 = 10, 24
    x2 = jax.random.normal(jax.random.PRNGKey(1), (B2, C2), dtype=jnp.bfloat16)
    out2 = entropy_loss(x2)
    jax.block_until_ready(out2)
    ref2 = entropy_loss_ref(x2)
    assert jnp.allclose(out2, ref2, atol=1e-2, rtol=1e-2), (out2, ref2)

    print("KERNEL_OK")
</pallas_src>

<mosaic_0001>
module attributes {stable_mosaic.version = 11 : i64} {
  func.func @_entropy_loss_kernel(%arg0: i32, %arg1: memref<16x32xf32, #tpu.memory_space<vmem>>, %arg2: memref<1x8x128xf32, #tpu.memory_space<vmem>>) attributes {dimension_semantics = [#tpu.dimension_semantics<parallel>], iteration_bounds = array<i64: 1>, scalar_prefetch = 0 : i64, scratch_operands = 0 : i64, tpu.core_type = #tpu.core_type<tc>, window_params = [{transform_indices = @transform_0, window_bounds = array<i64: 16, 32>}, {transform_indices = @transform_1, window_bounds = array<i64: 1, 8, 128>}]} {
    %c0 = arith.constant 0 : index
    %c0_0 = arith.constant 0 : index
    %0 = vector.load %arg1[%c0, %c0_0] : memref<16x32xf32, #tpu.memory_space<vmem>>, vector<16x32xf32>
    %cst = arith.constant dense<0xFF800000> : vector<16xf32>
    %1 = vector.multi_reduction <maximumf>, %0, %cst [1] : vector<16x32xf32> to vector<16xf32>
    %2 = vector.shape_cast %1 : vector<16xf32> to vector<16x1xf32>
    %3 = vector.broadcast %2 : vector<16x1xf32> to vector<16x32xf32>
    %4 = arith.subf %0, %3 : vector<16x32xf32>
    %5 = math.exp %4 : vector<16x32xf32>
    %cst_1 = arith.constant dense<0.000000e+00> : vector<16xf32>
    %6 = vector.multi_reduction <add>, %5, %cst_1 [1] : vector<16x32xf32> to vector<16xf32>
    %7 = vector.shape_cast %6 : vector<16xf32> to vector<16x1xf32>
    %8 = arith.mulf %5, %4 : vector<16x32xf32>
    %cst_2 = arith.constant dense<0.000000e+00> : vector<16xf32>
    %9 = vector.multi_reduction <add>, %8, %cst_2 [1] : vector<16x32xf32> to vector<16xf32>
    %10 = vector.shape_cast %9 : vector<16xf32> to vector<16x1xf32>
    %11 = arith.divf %10, %7 : vector<16x1xf32>
    %12 = math.log %7 : vector<16x1xf32>
    %13 = arith.subf %11, %12 : vector<16x1xf32>
    %c16_i32 = arith.constant 16 : i32
    %14 = arith.muli %arg0, %c16_i32 : i32
    %15 = tpu.iota {dimensions = array<i32: 0>} : vector<16x1xi32>
    %16 = vector.broadcast %14 : i32 to vector<16x1xi32>
    %17 = arith.addi %16, %15 : vector<16x1xi32>
    %c16_i32_3 = arith.constant 16 : i32
    %18 = vector.broadcast %c16_i32_3 : i32 to vector<16x1xi32>
    %19 = arith.cmpi slt, %17, %18 : vector<16x1xi32>
    %cst_4 = arith.constant 0.000000e+00 : f32
    %20 = vector.broadcast %cst_4 : f32 to vector<16x1xf32>
    %21 = arith.select %19, %13, %20 : vector<16x1xi1>, vector<16x1xf32>
    %22 = vector.shape_cast %21 : vector<16x1xf32> to vector<1x16x1xf32>
    %cst_5 = arith.constant dense<0.000000e+00> : vector<1xf32>
    %23 = vector.multi_reduction <add>, %22, %cst_5 [1, 2] : vector<1x16x1xf32> to vector<1xf32>
    %24 = vector.shape_cast %23 : vector<1xf32> to vector<1x1x1xf32>
    %25 = vector.extract %24[0, 0, 0] : f32 from vector<1x1x1xf32>
    %26 = vector.broadcast %25 : f32 to vector<1x8x128xf32>
    %c0_6 = arith.constant 0 : index
    %c0_7 = arith.constant 0 : index
    %c0_8 = arith.constant 0 : index
    %27 = vector.load %arg2[%c0_6, %c0_7, %c0_8] : memref<1x8x128xf32, #tpu.memory_space<vmem>>, vector<1x8x128xf32>
    tpu.vector_store %arg2[%c0_6, %c0_7, %c0_8], %26 {strides = array<i32>} : memref<1x8x128xf32, #tpu.memory_space<vmem>>, vector<1x8x128xf32>,
    return
  }
  func.func @transform_0(%arg0: i32) -> (i32, i32) {
    %c0_i32 = arith.constant 0 : i32
    %c0_i32_0 = arith.constant 0 : i32
    return %arg0, %c0_i32 : i32, i32
  }
  func.func @transform_1(%arg0: i32) -> (i32, i32, i32) {
    %c0_i32 = arith.constant 0 : i32
    %c0_i32_0 = arith.constant 0 : i32
    %c0_i32_1 = arith.constant 0 : i32
    return %arg0, %c0_i32, %c0_i32_0 : i32, i32, i32
  }
}

</mosaic_0001>

<bundles_post_ra>
// kernel: tpu_custom_call.1
= control target key start
LH: loop header
LB: loop body
LE: loop exit
PB: predicated region body
PF: predicated region fallthrough
CT: control target
= control target key end

     0   :  { %6 = vsyncpa [#allocation3], 0  ;;  %s213_s0 = inlined_call_operand.hbm [shape: f32[16,32], index: 0, kind: input, shape index: {}]   ;;  %s214_s1 = inlined_call_operand.hbm [shape: f32[1,8,128], index: 1, kind: output, shape index: {}]  }
   0x1   :  { %7 = vsyncpa [#allocation4], 0  ;;  %s169_s6 = smov [#allocation2]   ;;  %s121_s10 = scalar_lea.hbm %s213_s0, 256 }
   0x2   :  { %s13_s7 = sshll.u32 %s169_s6, 4  ;;  %p122_p0 = scmp.ne.s32.totalorder %s213_s0, %s121_s10  ;;  %s14_s7 = int_to_ptr.vmem [resolvable:$true] %s13_s7 }
   0x3   :  { %p125_p1 = scmp.lt.u32.totalorder %s121_s10, %s213_s0 }
   0x5   :  { %p127_p2 = pnand %p125_p1, %p122_p0 }
   0x7   :  { %130 = shalt.err (!%p127_p2)
}
   0x8   :  { %s131_s15 = scalar_lea.vmem %s14_s7, 256  ;;  %p136_p4 = scmp.lt.s32.totalorder %s14_s7, %s14_s7 }
   0x9   :  { %p132_p3 = scmp.ne.s32.totalorder %s14_s7, %s131_s15  ;;  %p137_p5 = scmp.lt.s32.totalorder %s131_s15, %s131_s15 }
   0xb   :  { %p138_p6 = por %p137_p5, %p136_p4 }
   0xd   :  { %p139_p7 = pnand %p138_p6, %p132_p3 }
   0xf   :  { %142 = shalt.err (!%p139_p7)
}
  0x10   :  { %s170_s16 = smov 128   ;;  %s171_s17 = smov 8  }
  0x11   :  { %19 = dma.hbm_to_vmem [thread:$0]  %s213_s0, 256, %s14_s7, [#allocation3], %s170_s16, %s170_s16, %s171_s17  }
  0x12   :  { %165 = dma.done.wait [#allocation3], 256  }
  0x13   :  { %166 = vsyncadd [#allocation3], 4294967040  ;;  %vm25_vm0 = vcmask 261120   ;;  %v23_v0 = vld [vmem:[#allocation2] sm:$0xff]  ;;  %v24_v1 = vld [vmem:[#allocation2 + $0x8] sm:$0xff]  ;;  %vm73_vm1 = vcmask 7168  }
  0x14   :  { %v26_v2 = vsel %vm25_vm0, %v23_v0, -inf  ;;  %v29_v3 = vsel %vm25_vm0, %v24_v1, -inf  ;;  %s172_s0 = smov [#allocation5]  }
  0x15   :  { %27 = vmax.xlane.f32.xlu0 %v26_v2  ;;  %s94_s20 = sshll.u32 %s172_s0, 4  ;;  %s95_s20 = int_to_ptr.vmem [resolvable:$true] %s94_s20 }
  0x16   :  { %s143_s22 = scalar_lea.vmem %s95_s20, 128  ;;  %p148_p9 = scmp.lt.s32.totalorder %s95_s20, %s95_s20 }
  0x17   :  { %p144_p8 = scmp.ne.s32.totalorder %s95_s20, %s143_s22  ;;  %p149_p10 = scmp.lt.s32.totalorder %s143_s22, %s143_s22 }
  0x19   :  { %30 = vmax.xlane.f32.xlu0 %v29_v3  ;;  %p150_p11 = por %p149_p10, %p148_p9 }
  0x1b   :  { %p151_p12 = pnand %p150_p11, %p144_p8 }
  0xa2   :  { %v28_v4 = vpop.xlane.xlu0 %27 }
  0xa3   :  { %v32_v5 = vsub.f32 %v23_v0, %v28_v4 }
  0xa5   :  { %v34_v6 = vmul.f32 1.442695, %v32_v5 }
  0xa6   :  { %v31_v7 = vpop.xlane.xlu0 %30 }
  0xa7   :  { %109 = vpow2.f32 %v34_v6  ;;  %v33_v8 = vsub.f32 %v24_v1, %v31_v7 }
  0xa9   :  { %v36_v9 = vmul.f32 1.442695, %v33_v8 }
  0xab   :  { %111 = vpow2.f32 %v36_v9 }
  0xb1   :  { %v110_v10 = vpop.eup %109 }
  0xb2   :  { %v38_v11 = vsel %vm25_vm0, %v110_v10, 0.0  ;;  %v44_v12 = vmul.f32 %v110_v10, %v32_v5 }
  0xb3   :  { %39 = vadd.xlane.f32.xlu1 %v38_v11 }
  0xb4   :  { %v46_v13 = vsel %vm25_vm0, %v44_v12, 0.0 }
  0xb5   :  { %v112_v14 = vpop.eup %111  ;;  %47 = vadd.xlane.f32.xlu0 %v46_v13 }
  0xb6   :  { %v41_v15 = vsel %vm25_vm0, %v112_v14, 0.0  ;;  %v45_v16 = vmul.f32 %v112_v14, %v33_v8 }
  0xb7   :  { %42 = vadd.xlane.f32.xlu1 %v41_v15 }
  0xb8   :  { %v49_v17 = vsel %vm25_vm0, %v45_v16, 0.0 }
  0xbb   :  { %50 = vadd.xlane.f32.xlu1 %v49_v17 }
 0x140   :  { %v40_v18 = vpop.xlane.xlu1 %39 }
 0x141   :  { %113 = vrcp.f32 %v40_v18 }
 0x142   :  { %115 = vlog2.f32 %v40_v18  ;;  %v48_v22 = vpop.xlane.xlu0 %47 }
 0x144   :  { %v43_v19 = vpop.xlane.xlu1 %42 }
 0x145   :  { %117 = vrcp.f32 %v43_v19 }
 0x146   :  { %119 = vlog2.f32 %v43_v19 }
 0x148   :  { %v51_v26 = vpop.xlane.xlu1 %50 }
 0x14b   :  { %v114_v20 = vpop.eup %113 }
 0x14c   :  { %v116_v21 = vpop.eup %115  ;;  %v53_v24 = vmul.f32 %v114_v20, %v48_v22 }
 0x14d   :  { %v57_v23 = vmul.f32 0.6931472, %v116_v21 }
 0x14f   :  { %v118_v25 = vpop.eup %117  ;;  %v60_v29 = vsub.f32 %v53_v24, %v57_v23 }
 0x150   :  { %v120_v27 = vpop.eup %119  ;;  %v55_v28 = vmul.f32 %v118_v25, %v51_v26 }
 0x151   :  { %v59_v30 = vmul.f32 0.6931472, %v120_v27  ;;  %v74_v32 = vsel %vm73_vm1, %v60_v29, 0.0 }
 0x153   :  { %v61_v31 = vsub.f32 %v55_v28, %v59_v30 }
 0x155   :  { %v75_v33 = vsel %vm73_vm1, %v61_v31, 0.0 }
 0x156   :  { %v76_v34 = vadd.f32 %v75_v33, %v74_v32 }
 0x158   :  { %77 = vadd.xlane.f32.xlu0 %v76_v34 }
 0x1e5   :  { %v78_v35 = vpop.xlane.xlu0 %77 }
 0x1e6   :  { %v79_v36 = vrot.slane %v78_v35, 4 }
 0x1e8   :  { %v80_v37 = vadd.f32 %v79_v36, %v78_v35 }
 0x1ea   :  { %v81_v38 = vrot.slane %v80_v37, 2 }
 0x1ec   :  { %v82_v39 = vadd.f32 %v81_v38, %v80_v37 }
 0x1ee   :  { %v83_v40 = vrot.slane %v82_v39, 1 }
 0x1f0   :  { %v84_v41 = vadd.f32 %v83_v40, %v82_v39 }
 0x1f2   :  { %103 = vpush %v84_v41 }
 0x223   :  { %s104_s21 = spop %103 }
 0x224   :  { %v86_v42 = vstv %s104_s21 }
 0x225   :  { %87 = vst [vmem:[#allocation5] sm:$0xff] %v86_v42 }
 0x226   :  { %154 = shalt.err (!%p151_p12)
}
 0x227   :  { %s155_s25 = scalar_lea.hbm %s214_s1, 128 }
 0x228   :  { %p156_p13 = scmp.ne.s32.totalorder %s214_s1, %s155_s25  ;;  %p159_p0 = scmp.lt.u32.totalorder %s155_s25, %s214_s1 }
 0x22a   :  { %p161_p1 = pnand %p159_p0, %p156_p13 }
 0x22c   :  { %164 = shalt.err (!%p161_p1)
}
 0x22d   :  { %97 = dma.vmem_to_hbm [thread:$0]  %s95_s20, 128, %s214_s1, [#allocation4]  }
 0x22e   :  { %167 = dma.done.wait [#allocation4], 128  }
 0x22f   :  { %168 = vsyncadd [#allocation4], 4294967168 }
 0x230   :  { %101 = vsyncpa [#allocation3], 1 }
 0x231   :  { %102 = vsyncpa [#allocation4], 1 }

</bundles_post_ra>
